<compile_context>
chip_gen: v5e
topology: v5e:2x2
jax: 0.10.0
libtpu: 0.0.40
codegen_flags: <defaults>
</compile_context>

<pallas_src>
import jax
import jax.numpy as jnp
from jax.experimental import pallas as pl
from jax.experimental.pallas import tpu as pltpu


def attention_kernel(x_ref, w_ref, o_ref):
    """One batch tile: scores (VPU + lane reduce), softmax over seq, weighted reduction."""
    # Upcast to f32 for the softmax / accumulation (also supports bf16-streamed inputs).
    x = x_ref[...].astype(jnp.float32)          # (TB, S, D)
    w_row = w_ref[...].astype(jnp.float32)      # (1, D) — lane-aligned with x's D axis

    # scores = sum_D(x * w) — cheap VPU mul + lane reduce; keep it off the MXU.
    scores = jnp.sum(x * w_row[None], axis=-1)  # (TB, S), S on the lane axis

    # Numerically stable softmax over the sequence axis (PyTorch dim=1), dense 2-D layout.
    m = jnp.max(scores, axis=-1, keepdims=True)        # (TB, 1)
    e = jnp.exp(scores - m)                             # (TB, S)
    denom = jnp.sum(e, axis=-1, keepdims=True)          # (TB, 1)

    # Deferred normalization: accumulate unnormalized weighted sum, exact divide once.
    acc = jnp.sum(x * e[:, :, None], axis=1)             # (TB, D)
    o_ref[...] = (acc / denom).astype(o_ref.dtype)


def _pick_batch_tile(B, S, D, itemsize, budget_bytes=8 << 20):
    """Largest batch tile whose x-block fits ~8 MiB (2 pipeline buffers << scoped VMEM,
    safe on v7x's 64 MiB VMEM) and that divides B; prefer multiples of 8 for full sublanes."""
    rows = max(1, budget_bytes // max(1, S * D * itemsize))
    if B <= rows:
        return B
    tb = (min(rows, B) // 8) * 8
    while tb >= 8:
        if B % tb == 0:
            return tb
        tb -= 8
    return B  # fallback: whole batch in one tile


def attention_layer(x, w):
    """x: (B, S, D) float, w: (D, 1) float -> (B, D) in x.dtype."""
    B, S, D = x.shape
    w_row = w.reshape(1, D)  # lane-dense parameter layout (D on the lane axis)

    TB = _pick_batch_tile(B, S, D, x.dtype.itemsize)
    grid = (B // TB,)

    return pl.pallas_call(
        attention_kernel,
        out_shape=jax.ShapeDtypeStruct((B, D), x.dtype),
        grid=grid,
        in_specs=[
            # x streamed in batch tiles; full S and D kept in-block (softmax needs whole seq).
            pl.BlockSpec((TB, S, D), lambda i: (i, 0, 0)),
            # attention weight vector: tiny, resident, same block every step.
            pl.BlockSpec((1, D), lambda i: (0, 0)),
        ],
        out_specs=pl.BlockSpec((TB, D), lambda i: (i, 0)),
        compiler_params=pltpu.CompilerParams(
            # Batch tiles are independent — shard across TensorCores on v7x (no-op on v5e/v6e).
            dimension_semantics=("parallel",),
        ),
    )(x, w_row)


def attention_layer_ref(x, w):
    """Pure-JAX reference mirroring the PyTorch forward (f32-exact matmul), for validation."""
    scores = jnp.squeeze(
        jnp.matmul(x, w, precision=jax.lax.Precision.HIGHEST), -1)   # (B, S)
    attn = jax.nn.softmax(scores, axis=1)[..., None]                 # (B, S, 1)
    return jnp.sum(x * attn, axis=1)                                 # (B, D)


if __name__ == "__main__":
    # Small shapes consistent with the module: batch=2, seq=8, feature_dim=32.
    B, S, D = 2, 8, 32
    key = jax.random.PRNGKey(0)
    kx, kw = jax.random.split(key)

    x = jax.random.normal(kx, (B, S, D), dtype=jnp.float32)
    # Deterministic synthetic parameter (PyTorch: nn.Parameter(torch.randn(feature_dim, 1)))
    w = jax.random.normal(kw, (D, 1), dtype=jnp.float32)

    out = attention_layer(x, w)
    out = jax.block_until_ready(out)

    ref = attention_layer_ref(x, w)
    assert out.shape == (B, D)
    assert jnp.allclose(out, ref, atol=1e-4, rtol=1e-4), "Pallas output mismatch vs reference"

    print("KERNEL_OK")
</pallas_src>

<mosaic_0001>
module attributes {stable_mosaic.version = 11 : i64} {
  func.func @attention_kernel(%arg0: i32, %arg1: memref<2x8x32xf32, #tpu.memory_space<vmem>>, %arg2: memref<1x32xf32, #tpu.memory_space<vmem>>, %arg3: memref<2x32xf32, #tpu.memory_space<vmem>>) attributes {dimension_semantics = [#tpu.dimension_semantics<parallel>], iteration_bounds = array<i64: 1>, scalar_prefetch = 0 : i64, scratch_operands = 0 : i64, tpu.core_type = #tpu.core_type<tc>, window_params = [{transform_indices = @transform_0, window_bounds = array<i64: 2, 8, 32>}, {pipeline_mode = #tpu.pipeline_mode<synchronous>, transform_indices = @transform_1, window_bounds = array<i64: 1, 32>}, {transform_indices = @transform_2, window_bounds = array<i64: 2, 32>}]} {
    %c0 = arith.constant 0 : index
    %c0_0 = arith.constant 0 : index
    %c0_1 = arith.constant 0 : index
    %0 = vector.load %arg1[%c0, %c0_0, %c0_1] : memref<2x8x32xf32, #tpu.memory_space<vmem>>, vector<2x8x32xf32>
    %c0_2 = arith.constant 0 : index
    %c0_3 = arith.constant 0 : index
    %1 = vector.load %arg2[%c0_2, %c0_3] : memref<1x32xf32, #tpu.memory_space<vmem>>, vector<1x32xf32>
    %2 = vector.shape_cast %1 : vector<1x32xf32> to vector<1x1x32xf32>
    %3 = vector.broadcast %2 : vector<1x1x32xf32> to vector<2x8x32xf32>
    %4 = arith.mulf %0, %3 : vector<2x8x32xf32>
    %cst = arith.constant dense<0.000000e+00> : vector<2x8xf32>
    %5 = vector.multi_reduction <add>, %4, %cst [2] : vector<2x8x32xf32> to vector<2x8xf32>
    %cst_4 = arith.constant dense<0xFF800000> : vector<2xf32>
    %6 = vector.multi_reduction <maximumf>, %5, %cst_4 [1] : vector<2x8xf32> to vector<2xf32>
    %7 = vector.shape_cast %6 : vector<2xf32> to vector<2x1xf32>
    %8 = vector.broadcast %7 : vector<2x1xf32> to vector<2x8xf32>
    %9 = arith.subf %5, %8 : vector<2x8xf32>
    %10 = math.exp %9 : vector<2x8xf32>
    %cst_5 = arith.constant dense<0.000000e+00> : vector<2xf32>
    %11 = vector.multi_reduction <add>, %10, %cst_5 [1] : vector<2x8xf32> to vector<2xf32>
    %12 = vector.shape_cast %11 : vector<2xf32> to vector<2x1xf32>
    %13 = vector.shape_cast %10 : vector<2x8xf32> to vector<2x8x1xf32>
    %14 = vector.broadcast %13 : vector<2x8x1xf32> to vector<2x8x32xf32>
    %15 = arith.mulf %0, %14 : vector<2x8x32xf32>
    %cst_6 = arith.constant dense<0.000000e+00> : vector<2x32xf32>
    %16 = vector.multi_reduction <add>, %15, %cst_6 [1] : vector<2x8x32xf32> to vector<2x32xf32>
    %17 = vector.broadcast %12 : vector<2x1xf32> to vector<2x32xf32>
    %18 = arith.divf %16, %17 : vector<2x32xf32>
    %c0_7 = arith.constant 0 : index
    %c0_8 = arith.constant 0 : index
    %19 = vector.load %arg3[%c0_7, %c0_8] : memref<2x32xf32, #tpu.memory_space<vmem>>, vector<2x32xf32>
    tpu.vector_store %arg3[%c0_7, %c0_8], %18 {strides = array<i32>} : memref<2x32xf32, #tpu.memory_space<vmem>>, vector<2x32xf32>,
    return
  }
  func.func @transform_0(%arg0: i32) -> (i32, i32, i32) {
    %c0_i32 = arith.constant 0 : i32
    %c0_i32_0 = arith.constant 0 : i32
    %c0_i32_1 = arith.constant 0 : i32
    return %arg0, %c0_i32, %c0_i32_0 : i32, i32, i32
  }
  func.func @transform_1(%arg0: i32) -> (i32, i32) {
    %c0_i32 = arith.constant 0 : i32
    %c0_i32_0 = arith.constant 0 : i32
    %c0_i32_1 = arith.constant 0 : i32
    return %c0_i32, %c0_i32_0 : i32, i32
  }
  func.func @transform_2(%arg0: i32) -> (i32, i32) {
    %c0_i32 = arith.constant 0 : i32
    %c0_i32_0 = arith.constant 0 : i32
    return %arg0, %c0_i32 : i32, i32
  }
}

</mosaic_0001>

<bundles_post_ra>
// kernel: tpu_custom_call.1
= control target key start
LH: loop header
LB: loop body
LE: loop exit
PB: predicated region body
PF: predicated region fallthrough
CT: control target
= control target key end

     0   :  { %7 = vsyncpa [#allocation3], 0  ;;  %s308_s0 = inlined_call_operand.hbm [shape: f32[2,8,32], index: 0, kind: input, shape index: {}]   ;;  %s309_s1 = inlined_call_operand.hbm [shape: f32[1,32], index: 1, kind: input, shape index: {}]   ;;  %s310_s2 = inlined_call_operand.hbm [shape: f32[2,32], index: 2, kind: output, shape index: {}]  }
   0x1   :  { %8 = vsyncpa [#allocation6], 0 }
   0x2   :  { %9 = vsyncpa [#allocation4], 0  ;;  %s14_s11 = sshll.u32 %s308_s0, 4  ;;  %s269_s12 = smov [#allocation2]   ;;  %s15_s11 = int_to_ptr.hbm [resolvable:$true] %s14_s11 }
   0x3   :  { %s16_s13 = sshll.u32 %s269_s12, 4  ;;  %s28_s16 = sshll.u32 %s309_s1, 4  ;;  %s17_s13 = int_to_ptr.vmem [resolvable:$true] %s16_s13  ;;  %s29_s16 = int_to_ptr.hbm [resolvable:$true] %s28_s16 }
   0x4   :  { %s270_s17 = smov 128   ;;  %s271_s18 = smov 8  }
   0x5   :  { %22 = dma.hbm_to_vmem [thread:$0]  %s15_s11, 256, %s17_s13, [#allocation3], %s270_s17, %s270_s17, %s271_s18  }
   0x6   :  { %s272_s19 = smov [#allocation5]  }
   0x7   :  { %s30_s20 = sshll.u32 %s272_s19, 4  ;;  %s31_s20 = int_to_ptr.vmem [resolvable:$true] %s30_s20 }
   0x8   :  { %33 = dma.hbm_to_vmem [thread:$0]  %s29_s16, 16, %s31_s20, [#allocation6]  }
   0x9   :  { %263 = dma.done.wait [#allocation3], 256  }
   0xa   :  { %264 = vsyncadd [#allocation3], 4294967040 }
   0xb   :  { %265 = dma.done.wait [#allocation6], 16  }
   0xc   :  { %266 = vsyncadd [#allocation6], 4294967280  ;;  %v42_v0 = vld [vmem:[#allocation2] sm:$0xff]  ;;  %v182_v1 = vld [vmem:[#allocation5] ss:$0 sm:$0xff]  ;;  %vm50_vm0 = vcmask 261120   ;;  %v59_v8 = vlaneseq }
   0xd   :  { %v48_v2 = vmul.f32 %v182_v1, %v42_v0  ;;  %v43_v3 = vld [vmem:[#allocation2 + $0x8] sm:$0xff]  ;;  %vm63_vm1 = vcmask 1041409   ;;  %vm66_vm2 = vcmask 58368   ;;  %v273_v15 = vmov 0   ;;  %s274_s0 = smov [#allocation7]   ;;  %s162_s23 = sshll.u32 %s310_s2, 4  ;;  %s163_s23 = int_to_ptr.hbm [resolvable:$true] %s162_s23 }
   0xe   :  { %v49_v5 = vmul.f32 %v182_v1, %v43_v3  ;;  %v60_v9 = vand.u32 127, %v59_v8  ;;  %180 = vset.pattern.permute.xlu2 %v273_v15  ;;  %179 = vset.pattern.permute.xlu1 %v273_v15  ;;  %s160_s1 = sshll.u32 %s274_s0, 4  ;;  %vm153_vm11 = vcmask 254976   ;;  %s161_s1 = int_to_ptr.vmem [resolvable:$true] %s160_s1 }
   0xf   :  { %v51_v4 = vsel %vm50_vm0, %v48_v2, 0.0  ;;  %181 = vset.pattern.permute.xlu0 %v273_v15 }
  0x10   :  { %52 = vadd.xlane.f32.xlu0 %v51_v4  ;;  %v54_v6 = vsel %vm50_vm0, %v49_v5, 0.0 }
  0x18   :  { %55 = vadd.xlane.f32.xlu0 %v54_v6 }
  0x83   :  { %v53_v7 = vpop.xlane.xlu0 %52 }
  0x84   :  { %v61_v11 = vperm.slane %v53_v7, %v60_v9 }
  0x8b   :  { %v56_v10 = vpop.xlane.xlu0 %55 }
  0x8c   :  { %v62_v12 = vperm.slane %v56_v10, %v60_v9 }
  0x8e   :  { %v64_v13 = vsel %vm63_vm1, %v62_v12, %v61_v11 }
  0x8f   :  { %v67_v14 = vsel %vm66_vm2, %v64_v13, -inf }
  0x90   :  { %68 = vmax.xlane.f32.xlu1 %v67_v14 }
 0x103   :  { %v69_v16 = vpop.xlane.xlu1 %68 }
 0x104   :  { %v71_v17 = vperm.slane %v69_v16, 0  ;;  %v72_v18 = vperm.slane %v69_v16, 1 }
 0x106   :  { %v75_v19 = vsub.f32 %v53_v7, %v71_v17  ;;  %v76_v20 = vsub.f32 %v56_v10, %v72_v18 }
 0x108   :  { %v77_v21 = vmul.f32 1.442695, %v75_v19  ;;  %v79_v22 = vmul.f32 1.442695, %v76_v20 }
 0x10a   :  { %183 = vpow2.f32 %v77_v21 }
 0x10b   :  { %185 = vpow2.f32 %v79_v22 }
 0x110   :  { %v184_v23 = vpop.eup %183 }
 0x111   :  { %v186_v24 = vpop.eup %185  ;;  %84 = vperm.xlu1 %179, %v184_v23  }
 0x112   :  { %87 = vperm.xlu2 %180, %v186_v24  }
 0x16c   :  { %v88_v25 = vpop.permute.xlu2 %87 }
 0x16d   :  { %v90_v27 = vperm.slane %v88_v25, %v60_v9  ;;  %v99_v31 = vmul.f32 %v88_v25, %v43_v3 }
 0x16f   :  { %v107_v32 = vsel %vm50_vm0, %v99_v31, 0.0 }
 0x170   :  { %v108_v34 = vrot.slane %v107_v32, 4 }
 0x172   :  { %v109_v36 = vadd.f32 %v108_v34, %v107_v32 }
 0x174   :  { %v110_v40 = vrot.slane %v109_v36, 2 }
 0x176   :  { %v111_v43 = vadd.f32 %v110_v40, %v109_v36 }
 0x178   :  { %v112_v49 = vrot.slane %v111_v43, 1 }
 0x183   :  { %v85_v26 = vpop.permute.xlu1 %84 }
 0x184   :  { %v89_v28 = vperm.slane %v85_v26, %v60_v9  ;;  %v98_v33 = vmul.f32 %v85_v26, %v42_v0  ;;  %v113_v0 = vadd.f32 %v112_v49, %v111_v43 }
 0x186   :  { %v91_v29 = vsel %vm63_vm1, %v90_v27, %v89_v28  ;;  %v100_v35 = vsel %vm50_vm0, %v98_v33, 0.0 }
 0x187   :  { %v93_v30 = vsel %vm66_vm2, %v91_v29, 0.0  ;;  %v101_v37 = vrot.slane %v100_v35, 4 }
 0x188   :  { %94 = vadd.xlane.f32.xlu2 %v93_v30 }
 0x189   :  { %v102_v41 = vadd.f32 %v101_v37, %v100_v35 }
 0x18b   :  { %v103_v44 = vrot.slane %v102_v41, 2 }
 0x18d   :  { %v104_v50 = vadd.f32 %v103_v44, %v102_v41 }
 0x18f   :  { %v105_v59 = vrot.slane %v104_v50, 1 }
 0x191   :  { %v106_v4 = vadd.f32 %v105_v59, %v104_v50 }
 0x1fb   :  { %v95_v38 = vpop.xlane.xlu2 %94 }
 0x1fc   :  { %v115_v39 = vrot.slane %v95_v38, 1  ;;  %187 = vrcp.f32 %v95_v38  ;;  %vm123_vm4 = vweird.f32 %v95_v38  ;;  %v127_v53 = vand.u32 2147483647, %v95_v38 }
 0x1fd   :  { %v129_v54 = vand.u32 2147483648, %v95_v38 }
 0x1fe   :  { %189 = vrcp.f32 %v115_v39  ;;  %v144_v55 = vand.u32 2147483648, %v115_v39  ;;  %v142_v58 = vand.u32 2147483647, %v115_v39  ;;  %vm138_vm7 = vweird.f32 %v115_v39 }
 0x1ff   :  { %v130_v62 = vor.u32 1.1754944e-38, %v129_v54  ;;  %vm128_vm9 = vcmp.eq.f32.partialorder %v127_v53, 8.507059e+37 }
 0x200   :  { %v145_v63 = vor.u32 1.1754944e-38, %v144_v55  ;;  %vm143_vm10 = vcmp.eq.f32.partialorder %v142_v58, 8.507059e+37 }
 0x202   :  { %v188_v42 = vpop.eup %187 }
 0x203   :  { %v119_v45 = vmul.f32 %v188_v42, %v95_v38  ;;  %vm124_vm3 = vweird.f32 %v188_v42 }
 0x204   :  { %v190_v46 = vpop.eup %189  ;;  %vm125_vm6 = vmor %vm123_vm4, %vm124_vm3 }
 0x205   :  { %v120_v47 = vsub.f32 1.0, %v119_v45  ;;  %v134_v48 = vmul.f32 %v190_v46, %v115_v39  ;;  %vm139_vm5 = vweird.f32 %v190_v46 }
 0x206   :  { %vm140_vm8 = vmor %vm138_vm7, %vm139_vm5 }
 0x207   :  { %v121_v51 = vmul.f32 %v188_v42, %v120_v47  ;;  %v135_v52 = vsub.f32 1.0, %v134_v48 }
 0x209   :  { %v122_v56 = vadd.f32 %v188_v42, %v121_v51  ;;  %v136_v57 = vmul.f32 %v190_v46, %v135_v52 }
 0x20b   :  { %v126_v60 = vsel %vm125_vm6, %v188_v42, %v122_v56  ;;  %v137_v61 = vadd.f32 %v190_v46, %v136_v57 }
 0x20c   :  { %v131_v2 = vsel %vm128_vm9, %v130_v62, %v126_v60 }
 0x20d   :  { %v141_v1 = vsel %vm140_vm8, %v190_v46, %v137_v61  ;;  %v132_v6 = vmul.f32 %v131_v2, %v106_v4 }
 0x20e   :  { %v146_v3 = vsel %vm143_vm10, %v145_v63, %v141_v1 }
 0x20f   :  { %v147_v5 = vmul.f32 %v146_v3, %v113_v0 }
 0x211   :  { %v150_v7 = vrot.slane %v147_v5, 7 }
 0x213   :  { %v151_v8 = vsel %vm63_vm1, %v150_v7, %v132_v6 }
 0x214   :  { %154 = vst.msk [vmem:[#allocation7] sm:$0x3] %vm153_vm11, %v151_v8 }
 0x215   :  { %165 = dma.vmem_to_hbm [thread:$0]  %s161_s1, 32, %s163_s23, [#allocation4]  }
 0x216   :  { %267 = dma.done.wait [#allocation4], 32  }
 0x217   :  { %268 = vsyncadd [#allocation4], 4294967264 }
 0x218   :  { %170 = vsyncpa [#allocation3], 1 }
 0x219   :  { %171 = vsyncpa [#allocation6], 1 }
 0x21a   :  { %172 = vsyncpa [#allocation4], 1 }

</bundles_post_ra>
